<compile_context>
chip_gen: v5e
topology: v5e:2x2
jax: 0.10.0
libtpu: 0.0.40
codegen_flags: <defaults>
</compile_context>

<pallas_src>
import math

import jax
import jax.numpy as jnp
from jax.experimental import pallas as pl
from jax.experimental.pallas import tpu as pltpu


def dddqn_kernel(x_ref, w1_ref, b1_ref, w2_ref, b2_ref, wh_ref, bh_ref, out_ref):
    # One (tm, input_dim) row tile of the batch per grid step.  Weights/biases
    # are grid-invariant blocks (constant index_map) => resident in VMEM.
    x = x_ref[...]

    h1 = jnp.dot(x, w1_ref[...], preferred_element_type=jnp.float32) + b1_ref[...]
    h1 = jnp.maximum(h1, 0.0)

    h2 = jnp.dot(h1, w2_ref[...], preferred_element_type=jnp.float32) + b2_ref[...]
    h2 = jnp.maximum(h2, 0.0)

    # Fused value+advantage head: lane-dense [tm, 1 + output_dim] output tile.
    out_ref[...] = (jnp.dot(h2, wh_ref[...], preferred_element_type=jnp.float32)
                    + bh_ref[...]).astype(out_ref.dtype)


def dueling_dqn_forward(state, params, *, tm_max=1024):
    """state: [B, input_dim] float32. params: dict from init_params.

    Returns (v [B,1], a [B,output_dim]) exactly like the PyTorch module.
    """
    B, input_dim = state.shape
    fc1_dim = params["w1"].shape[1]
    fc2_dim = params["w2"].shape[1]
    output_dim = params["wa"].shape[1]

    # Fuse the two heads into one lane-dense matmul (wrapper-side concat).
    wh = jnp.concatenate([params["wv"], params["wa"]], axis=1)   # [fc2, 1+out]
    bh = jnp.concatenate([params["bv"], params["ba"]], axis=1)   # [1, 1+out]
    out_plus = 1 + output_dim

    # Row tile: multiple of 8 (f32 sublane), up to tm_max rows per step.
    b_rounded8 = ((B + 7) // 8) * 8
    tm = min(tm_max, b_rounded8)
    b_padded = ((B + tm - 1) // tm) * tm
    if b_padded != B:
        state = jnp.pad(state, ((0, b_padded - B), (0, 0)))

    grid = (b_padded // tm,)

    def const_spec(shape):
        # Grid-invariant block -> DMA'd once, stays VMEM-resident.
        return pl.BlockSpec(shape, lambda i: (0, 0))

    out = pl.pallas_call(
        dddqn_kernel,
        out_shape=jax.ShapeDtypeStruct((b_padded, out_plus), jnp.float32),
        grid=grid,
        in_specs=[
            pl.BlockSpec((tm, input_dim), lambda i: (i, 0)),   # state row tile
            const_spec((input_dim, fc1_dim)),                  # w1
            const_spec((1, fc1_dim)),                          # b1
            const_spec((fc1_dim, fc2_dim)),                    # w2
            const_spec((1, fc2_dim)),                          # b2
            const_spec((fc2_dim, out_plus)),                   # wh = [wv | wa]
            const_spec((1, out_plus)),                         # bh = [bv | ba]
        ],
        out_specs=pl.BlockSpec((tm, out_plus), lambda i: (i, 0)),
        compiler_params=pltpu.CompilerParams(
            dimension_semantics=("parallel",)),                # v7x: 2 TCs split rows
    )(state, params["w1"], params["b1"], params["w2"], params["b2"], wh, bh)

    out = out[:B]
    v = out[:, :1]
    a = out[:, 1:]
    return v, a


def init_params(key, input_dim, output_dim, fc1_dim, fc2_dim):
    """Deterministic init matching PyTorch nn.Linear default (U[-1/sqrt(fan_in), +])."""
    def linear(key, fan_in, fan_out):
        kw, kb = jax.random.split(key)
        bound = 1.0 / math.sqrt(fan_in)
        w = jax.random.uniform(kw, (fan_in, fan_out), jnp.float32, -bound, bound)
        b = jax.random.uniform(kb, (1, fan_out), jnp.float32, -bound, bound)
        return w, b

    k1, k2, k3, k4 = jax.random.split(key, 4)
    w1, b1 = linear(k1, input_dim, fc1_dim)
    w2, b2 = linear(k2, fc1_dim, fc2_dim)
    wv, bv = linear(k3, fc2_dim, 1)
    wa, ba = linear(k4, fc2_dim, output_dim)
    return dict(w1=w1, b1=b1, w2=w2, b2=b2, wv=wv, bv=bv, wa=wa, ba=ba)


def reference_forward(state, p):
    h1 = jnp.maximum(state @ p["w1"] + p["b1"], 0.0)
    h2 = jnp.maximum(h1 @ p["w2"] + p["b2"], 0.0)
    return h2 @ p["wv"] + p["bv"], h2 @ p["wa"] + p["ba"]


if __name__ == "__main__":
    input_dim, fc1_dim, fc2_dim, output_dim = 16, 32, 32, 4

    key = jax.random.PRNGKey(0)
    k_params, k_state1, k_state2 = jax.random.split(key, 3)
    params = init_params(k_params, input_dim, output_dim, fc1_dim, fc2_dim)

    # Small case (single tile).
    B1 = 8
    state1 = jax.random.normal(k_state1, (B1, input_dim), dtype=jnp.float32)
    v1, a1 = jax.block_until_ready(dueling_dqn_forward(state1, params))
    v1_ref, a1_ref = reference_forward(state1, params)
    assert v1.shape == (B1, 1) and a1.shape == (B1, output_dim)
    assert jnp.allclose(v1, v1_ref, atol=1e-5, rtol=1e-5)
    assert jnp.allclose(a1, a1_ref, atol=1e-5, rtol=1e-5)

    # Non-multiple-of-8 batch (exercises padding + row-tile grid path).
    B2 = 37
    state2 = jax.random.normal(k_state2, (B2, input_dim), dtype=jnp.float32)
    v2, a2 = jax.block_until_ready(dueling_dqn_forward(state2, params, tm_max=16))
    v2_ref, a2_ref = reference_forward(state2, params)
    assert v2.shape == (B2, 1) and a2.shape == (B2, output_dim)
    assert jnp.allclose(v2, v2_ref, atol=1e-5, rtol=1e-5)
    assert jnp.allclose(a2, a2_ref, atol=1e-5, rtol=1e-5)

    print("KERNEL_OK")
</pallas_src>

<mosaic_0001>
module attributes {stable_mosaic.version = 11 : i64} {
  func.func @dddqn_kernel(%arg0: i32, %arg1: memref<8x16xf32, #tpu.memory_space<vmem>>, %arg2: memref<16x32xf32, #tpu.memory_space<vmem>>, %arg3: memref<1x32xf32, #tpu.memory_space<vmem>>, %arg4: memref<32x32xf32, #tpu.memory_space<vmem>>, %arg5: memref<1x32xf32, #tpu.memory_space<vmem>>, %arg6: memref<32x5xf32, #tpu.memory_space<vmem>>, %arg7: memref<1x5xf32, #tpu.memory_space<vmem>>, %arg8: memref<8x5xf32, #tpu.memory_space<vmem>>) attributes {dimension_semantics = [#tpu.dimension_semantics<parallel>], iteration_bounds = array<i64: 1>, scalar_prefetch = 0 : i64, scratch_operands = 0 : i64, tpu.core_type = #tpu.core_type<tc>, window_params = [{transform_indices = @transform_0, window_bounds = array<i64: 8, 16>}, {pipeline_mode = #tpu.pipeline_mode<synchronous>, transform_indices = @transform_1, window_bounds = array<i64: 16, 32>}, {pipeline_mode = #tpu.pipeline_mode<synchronous>, transform_indices = @transform_2, window_bounds = array<i64: 1, 32>}, {pipeline_mode = #tpu.pipeline_mode<synchronous>, transform_indices = @transform_3, window_bounds = array<i64: 32, 32>}, {pipeline_mode = #tpu.pipeline_mode<synchronous>, transform_indices = @transform_4, window_bounds = array<i64: 1, 32>}, {pipeline_mode = #tpu.pipeline_mode<synchronous>, transform_indices = @transform_5, window_bounds = array<i64: 32, 5>}, {pipeline_mode = #tpu.pipeline_mode<synchronous>, transform_indices = @transform_6, window_bounds = array<i64: 1, 5>}, {transform_indices = @transform_7, window_bounds = array<i64: 8, 5>}]} {
    %c0 = arith.constant 0 : index
    %c0_0 = arith.constant 0 : index
    %0 = vector.load %arg1[%c0, %c0_0] : memref<8x16xf32, #tpu.memory_space<vmem>>, vector<8x16xf32>
    %c0_1 = arith.constant 0 : index
    %c0_2 = arith.constant 0 : index
    %1 = vector.load %arg2[%c0_1, %c0_2] : memref<16x32xf32, #tpu.memory_space<vmem>>, vector<16x32xf32>
    %cst = arith.constant dense<0.000000e+00> : vector<8x32xf32>
    %2 = tpu.matmul %0, %1, %cst {dimension_numbers = #tpu.dot_dimension_numbers<[1], [0], [0], [1], [0, 0, 1, 1], [], []>} : vector<8x16xf32>, vector<16x32xf32>, vector<8x32xf32> -> vector<8x32xf32>
    %c0_3 = arith.constant 0 : index
    %c0_4 = arith.constant 0 : index
    %3 = vector.load %arg3[%c0_3, %c0_4] : memref<1x32xf32, #tpu.memory_space<vmem>>, vector<1x32xf32>
    %4 = vector.broadcast %3 : vector<1x32xf32> to vector<8x32xf32>
    %5 = arith.addf %2, %4 : vector<8x32xf32>
    %cst_5 = arith.constant 0.000000e+00 : f32
    %6 = vector.broadcast %cst_5 : f32 to vector<8x32xf32>
    %7 = arith.maximumf %5, %6 : vector<8x32xf32>
    %c0_6 = arith.constant 0 : index
    %c0_7 = arith.constant 0 : index
    %8 = vector.load %arg4[%c0_6, %c0_7] : memref<32x32xf32, #tpu.memory_space<vmem>>, vector<32x32xf32>
    %cst_8 = arith.constant dense<0.000000e+00> : vector<8x32xf32>
    %9 = tpu.matmul %7, %8, %cst_8 {dimension_numbers = #tpu.dot_dimension_numbers<[1], [0], [0], [1], [0, 0, 1, 1], [], []>} : vector<8x32xf32>, vector<32x32xf32>, vector<8x32xf32> -> vector<8x32xf32>
    %c0_9 = arith.constant 0 : index
    %c0_10 = arith.constant 0 : index
    %10 = vector.load %arg5[%c0_9, %c0_10] : memref<1x32xf32, #tpu.memory_space<vmem>>, vector<1x32xf32>
    %11 = vector.broadcast %10 : vector<1x32xf32> to vector<8x32xf32>
    %12 = arith.addf %9, %11 : vector<8x32xf32>
    %cst_11 = arith.constant 0.000000e+00 : f32
    %13 = vector.broadcast %cst_11 : f32 to vector<8x32xf32>
    %14 = arith.maximumf %12, %13 : vector<8x32xf32>
    %c0_12 = arith.constant 0 : index
    %c0_13 = arith.constant 0 : index
    %15 = vector.load %arg6[%c0_12, %c0_13] : memref<32x5xf32, #tpu.memory_space<vmem>>, vector<32x5xf32>
    %cst_14 = arith.constant dense<0.000000e+00> : vector<8x5xf32>
    %16 = tpu.matmul %14, %15, %cst_14 {dimension_numbers = #tpu.dot_dimension_numbers<[1], [0], [0], [1], [0, 0, 1, 1], [], []>} : vector<8x32xf32>, vector<32x5xf32>, vector<8x5xf32> -> vector<8x5xf32>
    %c0_15 = arith.constant 0 : index
    %c0_16 = arith.constant 0 : index
    %17 = vector.load %arg7[%c0_15, %c0_16] : memref<1x5xf32, #tpu.memory_space<vmem>>, vector<1x5xf32>
    %18 = vector.broadcast %17 : vector<1x5xf32> to vector<8x5xf32>
    %19 = arith.addf %16, %18 : vector<8x5xf32>
    %c0_17 = arith.constant 0 : index
    %c0_18 = arith.constant 0 : index
    %20 = vector.load %arg8[%c0_17, %c0_18] : memref<8x5xf32, #tpu.memory_space<vmem>>, vector<8x5xf32>
    tpu.vector_store %arg8[%c0_17, %c0_18], %19 {strides = array<i32>} : memref<8x5xf32, #tpu.memory_space<vmem>>, vector<8x5xf32>,
    return
  }
  func.func @transform_0(%arg0: i32) -> (i32, i32) {
    %c0_i32 = arith.constant 0 : i32
    %c0_i32_0 = arith.constant 0 : i32
    return %arg0, %c0_i32 : i32, i32
  }
  func.func @transform_1(%arg0: i32) -> (i32, i32) {
    %c0_i32 = arith.constant 0 : i32
    %c0_i32_0 = arith.constant 0 : i32
    %c0_i32_1 = arith.constant 0 : i32
    return %c0_i32, %c0_i32_0 : i32, i32
  }
  func.func @transform_2(%arg0: i32) -> (i32, i32) {
    %c0_i32 = arith.constant 0 : i32
    %c0_i32_0 = arith.constant 0 : i32
    %c0_i32_1 = arith.constant 0 : i32
    return %c0_i32, %c0_i32_0 : i32, i32
  }
  func.func @transform_3(%arg0: i32) -> (i32, i32) {
    %c0_i32 = arith.constant 0 : i32
    %c0_i32_0 = arith.constant 0 : i32
    %c0_i32_1 = arith.constant 0 : i32
    return %c0_i32, %c0_i32_0 : i32, i32
  }
  func.func @transform_4(%arg0: i32) -> (i32, i32) {
    %c0_i32 = arith.constant 0 : i32
    %c0_i32_0 = arith.constant 0 : i32
    %c0_i32_1 = arith.constant 0 : i32
    return %c0_i32, %c0_i32_0 : i32, i32
  }
  func.func @transform_5(%arg0: i32) -> (i32, i32) {
    %c0_i32 = arith.constant 0 : i32
    %c0_i32_0 = arith.constant 0 : i32
    %c0_i32_1 = arith.constant 0 : i32
    return %c0_i32, %c0_i32_0 : i32, i32
  }
  func.func @transform_6(%arg0: i32) -> (i32, i32) {
    %c0_i32 = arith.constant 0 : i32
    %c0_i32_0 = arith.constant 0 : i32
    %c0_i32_1 = arith.constant 0 : i32
    return %c0_i32, %c0_i32_0 : i32, i32
  }
  func.func @transform_7(%arg0: i32) -> (i32, i32) {
    %c0_i32 = arith.constant 0 : i32
    %c0_i32_0 = arith.constant 0 : i32
    return %arg0, %c0_i32 : i32, i32
  }
}

</mosaic_0001>

<bundles_post_ra>
// kernel: tpu_custom_call.1
= control target key start
LH: loop header
LB: loop body
LE: loop exit
PB: predicated region body
PF: predicated region fallthrough
CT: control target
= control target key end

     0   :  { %12 = vsyncpa [#allocation3], 0  ;;  %s306_s0 = inlined_call_operand.vmem [shape: f32[8,16], index: 0, kind: input, shape index: {}]   ;;  %s307_s1 = inlined_call_operand.hbm [shape: f32[16,32], index: 1, kind: input, shape index: {}]   ;;  %s308_s2 = inlined_call_operand.vmem [shape: f32[1,32], index: 2, kind: input, shape index: {}]   ;;  %s309_s3 = inlined_call_operand.vmem [shape: f32[32,32], index: 3, kind: input, shape index: {}]   ;;  %s310_s4 = inlined_call_operand.vmem [shape: f32[1,32], index: 4, kind: input, shape index: {}]   ;;  %s311_s5 = inlined_call_operand.vmem [shape: f32[32,5], index: 5, kind: input, shape index: {}]   ;;  %s312_s6 = inlined_call_operand.vmem [shape: f32[1,5], index: 6, kind: input, shape index: {}]   ;;  %s313_s7 = inlined_call_operand.hbm [shape: f32[8,5], index: 7, kind: output, shape index: {}]  }
   0x1   :  { %13 = vsyncpa [#allocation4], 0  ;;  %s20_s26 = sshll.u32 %s307_s1, 4  ;;  %s220_s27 = smov [#allocation2]   ;;  %s21_s26 = int_to_ptr.hbm [resolvable:$true] %s20_s26 }
   0x2   :  { %s22_s28 = sshll.u32 %s220_s27, 4  ;;  %s221_s29 = smov 128   ;;  %s23_s28 = int_to_ptr.vmem [resolvable:$true] %s22_s28 }
   0x3   :  { %s222_s30 = smov 8  }
   0x4   :  { %28 = dma.hbm_to_vmem [thread:$0]  %s21_s26, 256, %s23_s28, [#allocation3], %s221_s29, %s221_s29, %s222_s30  }
   0x5   :  { %216 = dma.done.wait [#allocation3], 256  }
   0x6   :  { %217 = vsyncadd [#allocation3], 4294967040  ;;  %v45_v0 = vld [vmem:[#allocation2 + $0x8] sm:$0xff]  ;;  %v44_v1 = vld [vmem:[#allocation2] sm:$0xff]  ;;  %vm50_vm0 = vcmask 130048   ;;  %vm83_vm1 = vcmask 261120  }
   0x7   :  { %68 = vmatpush.msra.mxu0 %v45_v0  ;;  %v43_v2 = vld [vmem:[%s306_s0] sm:$0xff]  ;;  %v78_v3 = vld [vmem:[%s309_s3 + $0x18] sm:$0xff]  ;;  %v77_v4 = vld [vmem:[%s309_s3 + $0x10] sm:$0xff]  ;;  %s223_s28 = smov [#allocation5]   ;;  %s148_s9 = sshll.u32 %s313_s7, 4  ;;  %vm139_vm2 = vcmask 39936   ;;  %s149_s9 = int_to_ptr.hbm [resolvable:$true] %s148_s9 }
   0x8   :  { %99 = vmatpush.msra.mxu1 %v78_v3  ;;  %v76_v5 = vld [vmem:[%s309_s3 + $0x8] sm:$0xff]  ;;  %v75_v6 = vld [vmem:[%s309_s3] sm:$0xff]  ;;  %v111_v7 = vld [vmem:[%s311_s5 + $0x18] sm:$0xff]  ;;  %s146_s29 = sshll.u32 %s223_s28, 4  ;;  %s147_s29 = int_to_ptr.vmem [resolvable:$true] %s146_s29 }
   0x9   :  { %69 = vmatpush.msra.mxu0 %v44_v1  ;;  %131 = vmatpush.msra.mxu2 %v111_v7  ;;  %v165_v8 = vld [vmem:[%s308_s2] ss:$0 sm:$0xff]  ;;  %v110_v12 = vld [vmem:[%s311_s5 + $0x10] sm:$0xff]  ;;  %v109_v13 = vld [vmem:[%s311_s5 + $0x8] sm:$0xff] }
   0xa   :  { %158 = vmatmul.msk.f32.vlgmr.msra.gmra.mxu0 %vm50_vm0, %v43_v2  ;;  %100 = vmatpush.msra.mxu1 %v77_v4  ;;  %v108_v14 = vld [vmem:[%s311_s5] sm:$0xff] }
   0xb   :  { %132 = vmatpush.msra.mxu2 %v110_v12  ;;  %v166_v15 = vld [vmem:[%s310_s4] ss:$0 sm:$0xff] }
   0xc   :  { %101 = vmatpush.msra.mxu1 %v76_v5  ;;  %v167_v19 = vld [vmem:[%s312_s6] ss:$0 sm:$0xff] }
   0xd   :  { %133 = vmatpush.msra.mxu2 %v109_v13 }
   0xe   :  { %102 = vmatpush.msra.mxu1 %v75_v6 }
   0xf   :  { %134 = vmatpush.msra.mxu2 %v108_v14 }
  0x87   :  { %v71_v9 = vpop.f32.mrf.mxu0 }
  0x88   :  { %v72_v10 = vadd.f32 %v165_v8, %v71_v9 }
  0x8a   :  { %v74_v11 = vmax.f32 %v72_v10, 0.0 }
  0x8c   :  { %159 = vmatmul.msk.f32.vlgmr.msra.gmra.mxu1 %vm83_vm1, %v74_v11 }
 0x109   :  { %v104_v16 = vpop.f32.mrf.mxu1 }
 0x10a   :  { %v105_v17 = vadd.f32 %v166_v15, %v104_v16 }
 0x10c   :  { %v107_v18 = vmax.f32 %v105_v17, 0.0 }
 0x10e   :  { %160 = vmatmul.msk.f32.vlgmr.msra.gmra.mxu2 %vm83_vm1, %v107_v18 }
 0x191   :  { %v136_v20 = vpop.f32.mrf.mxu2 }
 0x192   :  { %v137_v21 = vadd.f32 %v167_v19, %v136_v20 }
 0x194   :  { %140 = vst.msk [vmem:[#allocation5] sm:$0xff] %vm139_vm2, %v137_v21 }
 0x195   :  { %151 = dma.vmem_to_hbm [thread:$0]  %s147_s29, 128, %s149_s9, [#allocation4]  }
 0x196   :  { %218 = dma.done.wait [#allocation4], 128  }
 0x197   :  { %219 = vsyncadd [#allocation4], 4294967168 }
 0x198   :  { %156 = vsyncpa [#allocation3], 1 }
 0x199   :  { %157 = vsyncpa [#allocation4], 1 }

</bundles_post_ra>
